<compile_context>
chip_gen: v5e
topology: v5e:2x2
jax: 0.10.0
libtpu: 0.0.40
codegen_flags: <defaults>
</compile_context>

<pallas_src>
import functools

import jax
import jax.numpy as jnp
from jax.experimental import pallas as pl
from jax.experimental.pallas import tpu as pltpu


# ----------------------------------------------------------------------------
# Fused FSM kernel
# ----------------------------------------------------------------------------
def _fsm_kernel(x_ref, wa_t_ref, w2_ref, o_ref, *, inv_hw):
    # x_ref:    (1, Cin,  HW)   one batch element, spatial flattened into lanes
    # wa_t_ref: (Cin, Cin)      conv_atten weight, transposed (wa_t[ci, co] = Wa[co, ci])
    # w2_ref:   (Cout, Cin)     final 1x1 conv weight
    # o_ref:    (1, Cout, HW)
    x = x_ref[0]                                             # (Cin, HW) f32
    cin, hw = x.shape
    cout = o_ref.shape[1]

    # Global average pool per channel (lane reduction on the XLU).
    mean = jnp.sum(x, axis=1, keepdims=True) * inv_hw        # (Cin, 1)

    # atten[c] = sigmoid(sum_j Wa[c, j] * mean[j]) computed as a sublane
    # reduction over the transposed weight -> row layout (1, Cin), no scalar
    # extracts and no MXU for a Cin x Cin matvec.
    att = jnp.sum(wa_t_ref[...] * mean, axis=0, keepdims=True)   # (1, Cin)
    scale = 1.0 + jax.nn.sigmoid(att)                            # (1, Cin)

    # Fold (x + x * atten) into the conv weights: out = (w2 * scale) @ x.
    w2_eff = w2_ref[...] * scale                                 # (Cout, Cin)

    if cin >= 64:
        # Real channel counts: contraction is big enough to feed the MXU.
        acc = jnp.dot(w2_eff, x, preferred_element_type=jnp.float32)
    else:
        # Tiny Cin: unrolled broadcast FMAs on the VPU (outer-product accumulate).
        acc = jnp.zeros((cout, hw), jnp.float32)
        for ci in range(cin):
            acc = acc + w2_eff[:, ci:ci + 1] * x[ci:ci + 1, :]

    o_ref[0] = acc                                               # lane-dense store


# ----------------------------------------------------------------------------
# Wrapper: NCHW in / NCHW out, all data movement is free reshapes
# ----------------------------------------------------------------------------
def fsm_forward(x_nchw, wa, w2):
    """x_nchw: (B, Cin, H, W); wa: (Cin, Cin); w2: (Cout, Cin)."""
    B, Cin, H, W = x_nchw.shape
    Cout = w2.shape[0]
    HW = H * W

    xf = x_nchw.reshape(B, Cin, HW)        # contiguous reshape (no transpose)
    wa_t = wa.T                            # tiny (Cin,Cin) weight transpose, trace-time

    out = pl.pallas_call(
        functools.partial(_fsm_kernel, inv_hw=1.0 / HW),
        out_shape=jax.ShapeDtypeStruct((B, Cout, HW), jnp.float32),
        grid=(B,),
        in_specs=[
            pl.BlockSpec((1, Cin, HW), lambda b: (b, 0, 0)),
            pl.BlockSpec((Cin, Cin), lambda b: (0, 0)),
            pl.BlockSpec((Cout, Cin), lambda b: (0, 0)),
        ],
        out_specs=pl.BlockSpec((1, Cout, HW), lambda b: (b, 0, 0)),
        compiler_params=pltpu.CompilerParams(
            dimension_semantics=("parallel",)),   # v7x: split batch over 2 TCs
    )(xf, wa_t, w2)
    return out.reshape(B, Cout, H, W)


# ----------------------------------------------------------------------------
# Pure-JAX reference (for correctness check)
# ----------------------------------------------------------------------------
def ref_forward(x, wa, w2):
    mean = jnp.mean(x, axis=(2, 3), keepdims=True)                  # (B, Cin, 1, 1)
    att = jax.nn.sigmoid(jnp.einsum("oi,bijk->bojk", wa, mean))     # (B, Cin, 1, 1)
    xs = x + x * att
    return jnp.einsum("oi,bihw->bohw", w2, xs)


# ----------------------------------------------------------------------------
if __name__ == "__main__":
    key = jax.random.PRNGKey(0)
    kx, k1, k2 = jax.random.split(key, 3)

    B, in_chan, out_chan, H, W = 2, 4, 8, 16, 16
    x = jax.random.normal(kx, (B, in_chan, H, W), dtype=jnp.float32)     # NCHW input
    wa = 0.3 * jax.random.normal(k1, (in_chan, in_chan), dtype=jnp.float32)   # conv_atten (1x1)
    w2 = 0.3 * jax.random.normal(k2, (out_chan, in_chan), dtype=jnp.float32)  # conv (1x1)

    out = jax.jit(fsm_forward)(x, wa, w2)
    out = jax.block_until_ready(out)

    assert out.shape == (B, out_chan, H, W), out.shape
    ref = ref_forward(x, wa, w2)
    err = float(jnp.max(jnp.abs(out - ref)))
    if err > 1e-4:
        raise AssertionError(f"Pallas output mismatch vs reference: max abs err = {err}")

    print("KERNEL_OK")
</pallas_src>

<mosaic_0001>
module attributes {stable_mosaic.version = 11 : i64} {
  func.func @_fsm_kernel(%arg0: i32, %arg1: memref<1x4x256xf32, #tpu.memory_space<vmem>>, %arg2: memref<4x4xf32, #tpu.memory_space<vmem>>, %arg3: memref<8x4xf32, #tpu.memory_space<vmem>>, %arg4: memref<1x8x256xf32, #tpu.memory_space<vmem>>) attributes {dimension_semantics = [#tpu.dimension_semantics<parallel>], iteration_bounds = array<i64: 2>, scalar_prefetch = 0 : i64, scratch_operands = 0 : i64, tpu.core_type = #tpu.core_type<tc>, window_params = [{transform_indices = @transform_0, window_bounds = array<i64: 1, 4, 256>}, {pipeline_mode = #tpu.pipeline_mode<synchronous>, transform_indices = @transform_1, window_bounds = array<i64: 4, 4>}, {pipeline_mode = #tpu.pipeline_mode<synchronous>, transform_indices = @transform_2, window_bounds = array<i64: 8, 4>}, {transform_indices = @transform_3, window_bounds = array<i64: 1, 8, 256>}]} {
    %c0 = arith.constant 0 : index
    %c0_0 = arith.constant 0 : index
    %c0_1 = arith.constant 0 : index
    %0 = vector.load %arg1[%c0, %c0_0, %c0_1] : memref<1x4x256xf32, #tpu.memory_space<vmem>>, vector<1x4x256xf32>
    %1 = vector.shape_cast %0 : vector<1x4x256xf32> to vector<4x256xf32>
    %cst = arith.constant dense<0.000000e+00> : vector<4xf32>
    %2 = vector.multi_reduction <add>, %1, %cst [1] : vector<4x256xf32> to vector<4xf32>
    %3 = vector.shape_cast %2 : vector<4xf32> to vector<4x1xf32>
    %cst_2 = arith.constant 3.906250e-03 : f32
    %4 = vector.broadcast %cst_2 : f32 to vector<4x1xf32>
    %5 = arith.mulf %3, %4 : vector<4x1xf32>
    %c0_3 = arith.constant 0 : index
    %c0_4 = arith.constant 0 : index
    %6 = vector.load %arg2[%c0_3, %c0_4] : memref<4x4xf32, #tpu.memory_space<vmem>>, vector<4x4xf32>
    %7 = vector.broadcast %5 : vector<4x1xf32> to vector<4x4xf32>
    %8 = arith.mulf %6, %7 : vector<4x4xf32>
    %cst_5 = arith.constant dense<0.000000e+00> : vector<4xf32>
    %9 = vector.multi_reduction <add>, %8, %cst_5 [0] : vector<4x4xf32> to vector<4xf32>
    %10 = vector.shape_cast %9 : vector<4xf32> to vector<1x4xf32>
    %11 = arith.negf %10 : vector<1x4xf32>
    %12 = math.exp %11 : vector<1x4xf32>
    %cst_6 = arith.constant 1.000000e+00 : f32
    %13 = vector.broadcast %cst_6 : f32 to vector<1x4xf32>
    %14 = arith.addf %13, %12 : vector<1x4xf32>
    %15 = arith.divf %13, %14 : vector<1x4xf32>
    %cst_7 = arith.constant 1.000000e+00 : f32
    %16 = vector.broadcast %cst_7 : f32 to vector<1x4xf32>
    %17 = arith.addf %16, %15 : vector<1x4xf32>
    %c0_8 = arith.constant 0 : index
    %c0_9 = arith.constant 0 : index
    %18 = vector.load %arg3[%c0_8, %c0_9] : memref<8x4xf32, #tpu.memory_space<vmem>>, vector<8x4xf32>
    %19 = vector.broadcast %17 : vector<1x4xf32> to vector<8x4xf32>
    %20 = arith.mulf %18, %19 : vector<8x4xf32>
    %cst_10 = arith.constant 0.000000e+00 : f32
    %21 = vector.broadcast %cst_10 : f32 to vector<8x256xf32>
    %22 = vector.extract_strided_slice %20 {offsets = [0, 0], sizes = [8, 1], strides = [1, 1]} : vector<8x4xf32> to vector<8x1xf32>
    %23 = vector.extract_strided_slice %1 {offsets = [0, 0], sizes = [1, 256], strides = [1, 1]} : vector<4x256xf32> to vector<1x256xf32>
    %24 = vector.broadcast %22 : vector<8x1xf32> to vector<8x256xf32>
    %25 = vector.broadcast %23 : vector<1x256xf32> to vector<8x256xf32>
    %26 = arith.mulf %24, %25 : vector<8x256xf32>
    %27 = arith.addf %21, %26 : vector<8x256xf32>
    %28 = vector.extract_strided_slice %20 {offsets = [0, 1], sizes = [8, 1], strides = [1, 1]} : vector<8x4xf32> to vector<8x1xf32>
    %29 = vector.extract_strided_slice %1 {offsets = [1, 0], sizes = [1, 256], strides = [1, 1]} : vector<4x256xf32> to vector<1x256xf32>
    %30 = vector.broadcast %28 : vector<8x1xf32> to vector<8x256xf32>
    %31 = vector.broadcast %29 : vector<1x256xf32> to vector<8x256xf32>
    %32 = arith.mulf %30, %31 : vector<8x256xf32>
    %33 = arith.addf %27, %32 : vector<8x256xf32>
    %34 = vector.extract_strided_slice %20 {offsets = [0, 2], sizes = [8, 1], strides = [1, 1]} : vector<8x4xf32> to vector<8x1xf32>
    %35 = vector.extract_strided_slice %1 {offsets = [2, 0], sizes = [1, 256], strides = [1, 1]} : vector<4x256xf32> to vector<1x256xf32>
    %36 = vector.broadcast %34 : vector<8x1xf32> to vector<8x256xf32>
    %37 = vector.broadcast %35 : vector<1x256xf32> to vector<8x256xf32>
    %38 = arith.mulf %36, %37 : vector<8x256xf32>
    %39 = arith.addf %33, %38 : vector<8x256xf32>
    %40 = vector.extract_strided_slice %20 {offsets = [0, 3], sizes = [8, 1], strides = [1, 1]} : vector<8x4xf32> to vector<8x1xf32>
    %41 = vector.extract_strided_slice %1 {offsets = [3, 0], sizes = [1, 256], strides = [1, 1]} : vector<4x256xf32> to vector<1x256xf32>
    %42 = vector.broadcast %40 : vector<8x1xf32> to vector<8x256xf32>
    %43 = vector.broadcast %41 : vector<1x256xf32> to vector<8x256xf32>
    %44 = arith.mulf %42, %43 : vector<8x256xf32>
    %45 = arith.addf %39, %44 : vector<8x256xf32>
    %c0_11 = arith.constant 0 : index
    %c0_12 = arith.constant 0 : index
    %c0_13 = arith.constant 0 : index
    %46 = vector.load %arg4[%c0_11, %c0_12, %c0_13] : memref<1x8x256xf32, #tpu.memory_space<vmem>>, vector<1x8x256xf32>
    %47 = vector.shape_cast %46 : vector<1x8x256xf32> to vector<8x256xf32>
    %48 = vector.shape_cast %45 : vector<8x256xf32> to vector<1x8x256xf32>
    tpu.vector_store %arg4[%c0_11, %c0_12, %c0_13], %48 {strides = array<i32>} : memref<1x8x256xf32, #tpu.memory_space<vmem>>, vector<1x8x256xf32>,
    return
  }
  func.func @transform_0(%arg0: i32) -> (i32, i32, i32) {
    %c0_i32 = arith.constant 0 : i32
    %c0_i32_0 = arith.constant 0 : i32
    %c0_i32_1 = arith.constant 0 : i32
    return %arg0, %c0_i32, %c0_i32_0 : i32, i32, i32
  }
  func.func @transform_1(%arg0: i32) -> (i32, i32) {
    %c0_i32 = arith.constant 0 : i32
    %c0_i32_0 = arith.constant 0 : i32
    %c0_i32_1 = arith.constant 0 : i32
    return %c0_i32, %c0_i32_0 : i32, i32
  }
  func.func @transform_2(%arg0: i32) -> (i32, i32) {
    %c0_i32 = arith.constant 0 : i32
    %c0_i32_0 = arith.constant 0 : i32
    %c0_i32_1 = arith.constant 0 : i32
    return %c0_i32, %c0_i32_0 : i32, i32
  }
  func.func @transform_3(%arg0: i32) -> (i32, i32, i32) {
    %c0_i32 = arith.constant 0 : i32
    %c0_i32_0 = arith.constant 0 : i32
    %c0_i32_1 = arith.constant 0 : i32
    return %arg0, %c0_i32, %c0_i32_0 : i32, i32, i32
  }
}

</mosaic_0001>

<bundles_post_ra>
// kernel: fsm_forward.1
= control target key start
LH: loop header
LB: loop body
LE: loop exit
PB: predicated region body
PF: predicated region fallthrough
CT: control target
= control target key end

     0   :  { %s398_s12 = smov 0   ;;  %s436_s0 = inlined_call_operand.vmem [shape: f32[2,4,256], index: 0, kind: input, shape index: {}]   ;;  %s437_s1 = inlined_call_operand.vmem [shape: f32[4,4], index: 1, kind: input, shape index: {}]   ;;  %s438_s2 = inlined_call_operand.vmem [shape: f32[8,4], index: 2, kind: input, shape index: {}]   ;;  %s439_s3 = inlined_call_operand.vmem [shape: f32[2,8,256], index: 3, kind: output, shape index: {}]  }
   0x1 LB: > { %s331_s13 = sadd.s32 4294967295, %s372_s12   ;;  %p335_p0 = scmp.ge.s32.totalorder %s372_s12, 1  ;;  %s372_s12 = sphi %s398_s12, %s13_s12  }
   0x2   : > { %p137_p1 = scmp.lt.s32.totalorder %s372_s12, 3 }
   0x4   : > { %p138_p2 = pnand %p335_p0, %p137_p1 }
   0x5   : > { %p161_p3 = scmp.lt.s32.totalorder (!%p138_p2), %s331_s13, 1 }
   0x6   : > { %141 = sbr.rel (%p138_p2) target bundleno = 323 (0x143), region = 32 }
   0xb   : > { %s441_s13 = smov (!%p161_p3, %s331_s13), 1  ;;  %vm178_vm0 = vcmask 1043456   ;;  %v374_v6 = vmov 3   ;;  %v375_v7 = vmov 1   ;;  %v376_v8 = vmov 0   ;;  %v215_v33 = vld [vmem:[%s438_s2] sm:$0xff] }
   0xc   : > { %s343_s14 = sshll.u32 %s441_s13, 3  ;;  %360 = vset.pattern.permute.xlu2 %v374_v6  ;;  %358 = vset.pattern.permute.xlu1 %v375_v7  ;;  %v185_v9 = vld [vmem:[%s437_s1] sm:$0xf]  ;;  %vm187_vm1 = vcmask 27648   ;;  %v377_v36 = vmov 2   ;;  %s344_s22 = sshll.u32 %s441_s13, 4 }
   0xd   : > { %s165_s17 = scalar_lea.vmem %s436_s0, %s343_s14  ;;  %357 = vset.pattern.permute.xlu0 %v376_v8  ;;  %s170_s25 = scalar_lea.vmem %s439_s3, %s344_s22 }
   0xe   : > { %v412_v0 = vld [vmem:[%s165_s17] sm:$0xff] }
   0xf   : > { %173 = vst [vmem:[#allocation1] ss:$2 sm:$0xff] %v412_v0  ;;  %v236_v37 = vperm.slane %v412_v0, 1  ;;  %v237_v38 = vperm.slane %v412_v0, 5  ;;  %v222_v39 = vperm.slane %v412_v0, 0  ;;  %v223_v40 = vperm.slane %v412_v0, 4 }
  0x10   : > { %v250_v42 = vperm.slane %v412_v0, 2  ;;  %v251_v43 = vperm.slane %v412_v0, 6  ;;  %v264_v49 = vperm.slane %v412_v0, 3  ;;  %v265_v50 = vperm.slane %v412_v0, 7 }
  0x11   : > { %v240_v44 = vperm.slane %v236_v37, 1  ;;  %v241_v45 = vperm.slane %v237_v38, 1  ;;  %v226_v46 = vperm.slane %v222_v39, 0  ;;  %v227_v47 = vperm.slane %v223_v40, 0 }
  0x12   : > { %v254_v51 = vperm.slane %v250_v42, 2  ;;  %v255_v52 = vperm.slane %v251_v43, 2  ;;  %v268_v57 = vperm.slane %v264_v49, 3  ;;  %v269_v58 = vperm.slane %v265_v50, 3 }
  0x16   : > { %v174_v1 = vld.sshfl [vmem:[#allocation1] sm:$0xff pattern:$0x75316420]  ;;  %v175_v2 = vld.sshfl [vmem:[#allocation1 + $0x8] sm:$0xff pattern:$0x75316420] }
  0x17   : > { %v179_v3 = vsel %vm178_vm0, %v174_v1, 0.0  ;;  %v180_v4 = vsel %vm178_vm0, %v175_v2, 0.0 }
  0x18   : > { %v181_v5 = vadd.f32 %v180_v4, %v179_v3 }
  0x1a   : > { %182 = vadd.xlane.f32.xlu0 %v181_v5 }
  0x8d   : > { %v183_v10 = vpop.xlane.xlu0 %182 }
  0x8e   : > { %v184_v11 = vmul.f32 0.00390625, %v183_v10 }
  0x90   : > { %v186_v12 = vmul.f32 %v185_v9, %v184_v11 }
  0x92   : > { %v188_v13 = vsel %vm187_vm1, %v186_v12, 0.0 }
  0x93   : > { %v189_v14 = vrot.slane %v188_v13, 4 }
  0x95   : > { %v190_v15 = vadd.f32 %v189_v14, %v188_v13 }
  0x97   : > { %v191_v16 = vrot.slane %v190_v15, 2 }
  0x99   : > { %v192_v17 = vadd.f32 %v191_v16, %v190_v15 }
  0x9b   : > { %v193_v18 = vrot.slane %v192_v17, 1 }
  0x9d   : > { %v194_v19 = vadd.f32 %v193_v18, %v192_v17 }
  0x9f   : > { %v340_v20 = vmul.f32 -1.442695, %v194_v19 }
  0xa1   : > { %362 = vpow2.f32 %v340_v20 }
  0xa7   : > { %v363_v21 = vpop.eup %362 }
  0xa8   : > { %v198_v22 = vadd.f32 1.0, %v363_v21 }
  0xaa   : > { %364 = vrcp.f32 %v198_v22  ;;  %v210_v26 = vand.u32 2147483648, %v198_v22  ;;  %v208_v28 = vand.u32 2147483647, %v198_v22  ;;  %vm204_vm3 = vweird.f32 %v198_v22 }
  0xac   : > { %v211_v30 = vor.u32 1.1754944e-38, %v210_v26  ;;  %vm209_vm5 = vcmp.eq.f32.partialorder %v208_v28, 8.507059e+37 }
  0xb0   : > { %v365_v23 = vpop.eup %364 }
  0xb1   : > { %v200_v24 = vmul.f32 %v365_v23, %v198_v22  ;;  %vm205_vm2 = vweird.f32 %v365_v23 }
  0xb2   : > { %vm206_vm4 = vmor %vm204_vm3, %vm205_vm2 }
  0xb3   : > { %v201_v25 = vsub.f32 1.0, %v200_v24 }
  0xb5   : > { %v202_v27 = vmul.f32 %v365_v23, %v201_v25 }
  0xb7   : > { %v203_v29 = vadd.f32 %v365_v23, %v202_v27 }
  0xb9   : > { %v207_v31 = vsel %vm206_vm4, %v365_v23, %v203_v29 }
  0xba   : > { %v212_v32 = vsel %vm209_vm5, %v211_v30, %v207_v31 }
  0xbb   : > { %v214_v34 = vadd.f32 1.0, %v212_v32 }
  0xbd   : > { %v216_v35 = vmul.f32 %v215_v33, %v214_v34 }
  0xbf   : > { %261 = vperm.xlu2 %360, %v216_v35   ;;  %233 = vperm.xlu1 %358, %v216_v35  }
  0xc0   : > { %219 = vperm.xlu0 %357, %v216_v35  }
  0xc7   : > { %359 = vset.pattern.permute.xlu1 %v377_v36 }
  0xc8   : > { %247 = vperm.xlu1 %359, %v216_v35   ;;  %361 = vset.pattern.permute.xlu0 %v374_v6 }
 0x119   : > { %v262_v59 = vpop.permute.xlu2 %261 }
 0x11a   : > { %v270_v2 = vmul.f32 %v268_v57, %v262_v59  ;;  %v271_v3 = vmul.f32 %v269_v58, %v262_v59 }
 0x131   : > { %v234_v41 = vpop.permute.xlu1 %233 }
 0x132   : > { %v220_v48 = vpop.permute.xlu0 %219  ;;  %v242_v53 = vmul.f32 %v240_v44, %v234_v41  ;;  %v243_v54 = vmul.f32 %v241_v45, %v234_v41 }
 0x133   : > { %v228_v55 = vmul.f32 %v226_v46, %v220_v48  ;;  %v229_v56 = vmul.f32 %v227_v47, %v220_v48 }
 0x135   : > { %v244_v61 = vadd.f32 %v242_v53, %v228_v55  ;;  %v245_v62 = vadd.f32 %v243_v54, %v229_v56 }
 0x13a   : > { %v248_v60 = vpop.permute.xlu1 %247 }
 0x13b   : > { %v256_v63 = vmul.f32 %v254_v51, %v248_v60  ;;  %v257_v1 = vmul.f32 %v255_v52, %v248_v60 }
 0x13d   : > { %v258_v4 = vadd.f32 %v256_v63, %v244_v61  ;;  %v259_v5 = vadd.f32 %v257_v1, %v245_v62 }
 0x13f   : > { %v272_v0 = vadd.f32 %v270_v2, %v258_v4  ;;  %v273_v6 = vadd.f32 %v271_v3, %v259_v5 }
 0x141   : > { %274 = vst [vmem:[%s170_s25] sm:$0xff] %v272_v0 }
 0x142   : > { %275 = vst [vmem:[%s170_s25 + $0x8] sm:$0xff] %v273_v6 }
 0x143 PF: > { %s13_s12 = sadd.s32 1, %s372_s12  }
 0x144   : > { %p10_p4 = scmp.ge.s32.totalorder %s13_s12, 4  }
 0x146   :  { %12 = sbr.rel (!%p10_p4) target bundleno = 1 (0x1), region = 62 }

</bundles_post_ra>
